<compile_context>
chip_gen: v7x
topology: tpu7x:2x2x1
jax: 0.10.0
libtpu: 0.0.40
codegen_flags: <defaults>
</compile_context>

<pallas_src>
import jax
import jax.numpy as jnp
from jax.experimental import pallas as pl
from jax.experimental.pallas import tpu as pltpu


def _round_up(v, m):
    return ((v + m - 1) // m) * m


def _cdiv(a, b):
    return (a + b - 1) // b


def attention_pool_kernel(x_ref, w_ref, o_ref):
    # x_ref: (TB, S, D) block of input rows       (VMEM, native dtype)
    # w_ref: (D, 1)     attention weight column   (VMEM, native dtype)
    # o_ref: (TB, D)    pooled output block       (VMEM)
    TB, S, D = x_ref.shape
    x = x_ref[...]                                          # native dtype, no f32 copy

    # Per-row logits on the MXU: a single (TB*S, D) @ (D, 1) matmul, f32 accumulation.
    logits = jnp.dot(x.reshape(TB * S, D), w_ref[...],
                     preferred_element_type=jnp.float32)
    logits = logits.reshape(TB, S, 1)                       # major-dim expand (layout no-op)
    # nn.Linear bias intentionally dropped: softmax over S is invariant to it.

    # Numerically stable softmax over the sequence axis (dim=1 of the original tensor).
    m = jnp.max(logits, axis=1, keepdims=True)              # (TB, 1, 1)
    e = jnp.exp(logits - m)                                 # (TB, S, 1)
    denom = jnp.sum(e, axis=1, keepdims=True)               # (TB, 1, 1)
    attn = (e / denom).astype(x.dtype)                      # exact divide (HBM-bound => free)

    # Weighted sum over the sequence axis; f32 accumulation, no explicit f32 block copy.
    pooled = jnp.sum(x * attn, axis=1, dtype=jnp.float32)   # (TB, D)
    o_ref[...] = pooled.astype(o_ref.dtype)


def attention_pooling(x, w, b=None):
    """x: (B, S, D), w: (1, D) Linear weight, b: (1,) Linear bias -> (B, D).

    The bias is accepted for API parity but unused: softmax over the sequence
    axis is invariant to a per-row scalar shift of the logits.
    """
    del b
    B, S, D = x.shape
    itemsize = x.dtype.itemsize

    # ---- per-generation VMEM budget ----------------------------------------
    try:
        vmem_cap = int(pltpu.get_tpu_info().vmem_capacity_bytes)
    except Exception:
        vmem_cap = 64 << 20                       # conservative fallback (v7x per-TC VMEM)

    # VMEM footprint of one batch row of the x block (Mosaic pads lanes/sublanes).
    lanes = _round_up(D, 128)
    sub = max(8, 32 // itemsize)                  # sublane granularity: 8 f32, 16 bf16, 32 int8
    s_pad = _round_up(S, sub)
    row_x = s_pad * lanes * itemsize              # one batch row of the input block
    row_scratch = s_pad * lanes * 4               # f32-width in-kernel temporaries (x*attn)
    row_out = 2 * lanes * 4                       # double-buffered output row (generous)
    row_bytes = 2 * row_x + row_scratch + row_out  # 2x: double-buffered input

    usable = int(vmem_cap * 0.8) - (4 << 20)
    bb_fit = max(1, usable // row_bytes)          # what fits in VMEM
    bb_target = max(1, (8 << 20) // row_x)        # ~8 MiB per input buffer (mem-bound roofline)
    bb = min(bb_fit, bb_target)

    # Keep several grid steps for pipelining overlap / v7x's two TensorCores, when B allows.
    desired_steps = 4 if B >= 64 else (2 if B >= 16 else 1)
    bb = min(bb, max(1, _cdiv(B, desired_steps)))

    if bb >= B:
        block_b = B                               # single block == full dim (legal block shape)
    else:
        block_b = max(sub, (bb // sub) * sub)     # sublane-dense output blocks
        block_b = min(block_b, B)                 # (only hits B when B < 8)

    grid = (_cdiv(B, block_b),)

    # Weight column in the input dtype so the MXU consumes native-width operands
    # (f32 accumulation comes from preferred_element_type in the kernel).
    w_col = jnp.asarray(w).reshape(D, 1).astype(x.dtype)

    # ---- scoped-VMEM limit: actual need (incl. f32 temporaries), capped at ~85% physical ----
    x_blk_bytes = block_b * s_pad * lanes * itemsize
    out_blk_bytes = _round_up(block_b, 8) * lanes * 4
    w_bytes = _round_up(D, 8) * 128 * 4
    scratch_bytes = block_b * s_pad * lanes * 4
    vmem_needed = (2 * x_blk_bytes + 2 * out_blk_bytes + 2 * w_bytes
                   + scratch_bytes + (4 << 20))
    vmem_limit = int(min(max(vmem_needed, 32 << 20), int(vmem_cap * 0.85)))

    out = pl.pallas_call(
        attention_pool_kernel,
        out_shape=jax.ShapeDtypeStruct((B, D), x.dtype),
        grid_spec=pltpu.PrefetchScalarGridSpec(
            num_scalar_prefetch=0,
            grid=grid,
            in_specs=[
                pl.BlockSpec((block_b, S, D), lambda i: (i, 0, 0)),
                pl.BlockSpec((D, 1), lambda i: (0, 0)),
            ],
            out_specs=pl.BlockSpec((block_b, D), lambda i: (i, 0)),
        ),
        compiler_params=pltpu.CompilerParams(
            dimension_semantics=("parallel",),
            vmem_limit_bytes=vmem_limit,
        ),
    )(x, w_col)

    return out


def attention_pooling_ref(x, w, b):
    # Pure-JAX reference matching the PyTorch module (bias included here; it is
    # a mathematical no-op under the softmax).
    logits = jnp.einsum("bsd,od->bso", x, w) + b      # (B, S, 1)
    weights = jax.nn.softmax(logits, axis=1)          # softmax over the sequence axis
    return jnp.sum(x * weights, axis=1)               # (B, D)


if __name__ == "__main__":
    B, S, D = 2, 8, 32
    key = jax.random.PRNGKey(0)
    kx, kw, kb = jax.random.split(key, 3)

    x = jax.random.normal(kx, (B, S, D), dtype=jnp.float32)
    # Deterministic parameter init mimicking nn.Linear(D, 1): weight (1, D), bias (1,)
    bound = 1.0 / (D ** 0.5)
    w = jax.random.uniform(kw, (1, D), jnp.float32, minval=-bound, maxval=bound)
    b = jax.random.uniform(kb, (1,), jnp.float32, minval=-bound, maxval=bound)

    out = jax.block_until_ready(attention_pooling(x, w, b))
    ref = attention_pooling_ref(x, w, b)

    assert out.shape == (B, D)
    # Exact-divide softmax (no approx reciprocal) -> tight tolerance vs reference.
    assert jnp.allclose(out, ref, atol=1e-3, rtol=1e-3), "mismatch vs reference"

    print("KERNEL_OK")
</pallas_src>

<mosaic_0001>
module attributes {stable_mosaic.version = 11 : i64} {
  func.func @attention_pool_kernel(%arg0: i32, %arg1: memref<2x8x32xf32, #tpu.memory_space<vmem>>, %arg2: memref<32x1xf32, #tpu.memory_space<vmem>>, %arg3: memref<2x32xf32, #tpu.memory_space<vmem>>) attributes {dimension_semantics = [#tpu.dimension_semantics<parallel>], iteration_bounds = array<i64: 1>, scalar_prefetch = 0 : i64, scratch_operands = 0 : i64, tpu.core_type = #tpu.core_type<tc>, window_params = [{transform_indices = @transform_0, window_bounds = array<i64: 2, 8, 32>}, {pipeline_mode = #tpu.pipeline_mode<synchronous>, transform_indices = @transform_1, window_bounds = array<i64: 32, 1>}, {transform_indices = @transform_2, window_bounds = array<i64: 2, 32>}]} {
    %c0 = arith.constant 0 : index
    %c0_0 = arith.constant 0 : index
    %c0_1 = arith.constant 0 : index
    %0 = vector.load %arg1[%c0, %c0_0, %c0_1] : memref<2x8x32xf32, #tpu.memory_space<vmem>>, vector<2x8x32xf32>
    %1 = vector.shape_cast %0 : vector<2x8x32xf32> to vector<16x32xf32>
    %c0_2 = arith.constant 0 : index
    %c0_3 = arith.constant 0 : index
    %2 = vector.load %arg2[%c0_2, %c0_3] : memref<32x1xf32, #tpu.memory_space<vmem>>, vector<32x1xf32>
    %cst = arith.constant dense<0.000000e+00> : vector<16x1xf32>
    %3 = tpu.matmul %1, %2, %cst {dimension_numbers = #tpu.dot_dimension_numbers<[1], [0], [0], [1], [0, 0, 1, 1], [], []>} : vector<16x32xf32>, vector<32x1xf32>, vector<16x1xf32> -> vector<16x1xf32>
    %4 = vector.shape_cast %3 : vector<16x1xf32> to vector<2x8x1xf32>
    %cst_4 = arith.constant dense<0xFF800000> : vector<2x1xf32>
    %5 = vector.multi_reduction <maximumf>, %4, %cst_4 [1] : vector<2x8x1xf32> to vector<2x1xf32>
    %6 = vector.shape_cast %5 : vector<2x1xf32> to vector<2x1x1xf32>
    %7 = vector.broadcast %6 : vector<2x1x1xf32> to vector<2x8x1xf32>
    %8 = arith.subf %4, %7 : vector<2x8x1xf32>
    %9 = math.exp %8 : vector<2x8x1xf32>
    %cst_5 = arith.constant dense<0.000000e+00> : vector<2x1xf32>
    %10 = vector.multi_reduction <add>, %9, %cst_5 [1] : vector<2x8x1xf32> to vector<2x1xf32>
    %11 = vector.shape_cast %10 : vector<2x1xf32> to vector<2x1x1xf32>
    %12 = vector.broadcast %11 : vector<2x1x1xf32> to vector<2x8x1xf32>
    %13 = arith.divf %9, %12 : vector<2x8x1xf32>
    %14 = vector.broadcast %13 : vector<2x8x1xf32> to vector<2x8x32xf32>
    %15 = arith.mulf %0, %14 : vector<2x8x32xf32>
    %cst_6 = arith.constant dense<0.000000e+00> : vector<2x32xf32>
    %16 = vector.multi_reduction <add>, %15, %cst_6 [1] : vector<2x8x32xf32> to vector<2x32xf32>
    %c0_7 = arith.constant 0 : index
    %c0_8 = arith.constant 0 : index
    %17 = vector.load %arg3[%c0_7, %c0_8] : memref<2x32xf32, #tpu.memory_space<vmem>>, vector<2x32xf32>
    tpu.vector_store %arg3[%c0_7, %c0_8], %16 {strides = array<i32>} : memref<2x32xf32, #tpu.memory_space<vmem>>, vector<2x32xf32>,
    return
  }
  func.func @transform_0(%arg0: i32) -> (i32, i32, i32) {
    %c0_i32 = arith.constant 0 : i32
    %c0_i32_0 = arith.constant 0 : i32
    %c0_i32_1 = arith.constant 0 : i32
    return %arg0, %c0_i32, %c0_i32_0 : i32, i32, i32
  }
  func.func @transform_1(%arg0: i32) -> (i32, i32) {
    %c0_i32 = arith.constant 0 : i32
    %c0_i32_0 = arith.constant 0 : i32
    %c0_i32_1 = arith.constant 0 : i32
    return %c0_i32, %c0_i32_0 : i32, i32
  }
  func.func @transform_2(%arg0: i32) -> (i32, i32) {
    %c0_i32 = arith.constant 0 : i32
    %c0_i32_0 = arith.constant 0 : i32
    return %arg0, %c0_i32 : i32, i32
  }
}

</mosaic_0001>

<bundles_post_ra>
// kernel: tpu_custom_call.1
= control target key start
LH: loop header
LB: loop body
LE: loop exit
PB: predicated region body
PF: predicated region fallthrough
CT: control target
= control target key end

     0   :  { %vm18_vm0 = vcmask 261120   ;;  %s303_s0 = inlined_call_operand.vmem [shape: f32[2,8,32], index: 0, kind: input, shape index: {}]   ;;  %s304_s1 = inlined_call_operand.vmem [shape: f32[32,1], index: 1, kind: input, shape index: {}]   ;;  %s305_s2 = inlined_call_operand.hbm [shape: f32[2,32], index: 2, kind: output, shape index: {}]  }
   0x1   :  { %v14_v0 = vld [vmem:[%s304_s1] sm:$0xff]  ;;  %v15_v1 = vld [vmem:[%s304_s1 + $0x8] sm:$0xff]  ;;  %v16_v2 = vld [vmem:[%s304_s1 + $0x10] sm:$0xff] }
   0x2   :  { %v205_v3 = vpack.c.bf16 %v15_v1, %v14_v0  ;;  %v17_v4 = vld [vmem:[%s304_s1 + $0x18] sm:$0xff]  ;;  %v12_v5 = vld [vmem:[%s303_s0] sm:$0xff] }
   0x3   :  { %v209_v6 = vpack.c.bf16 %v17_v4, %v16_v2  ;;  %202 = vmatprep.mubr.msk.f32.mxu0 %vm18_vm0, %v12_v5 }
   0x4   :  { %7 = vsyncpa [#allocation3], 0  ;;  %206 = vmatprep.subr.bf16.mxu0 %v205_v3  ;;  %v13_v7 = vld [vmem:[%s303_s0 + $0x8] sm:$0xff]  ;;  %v248_v8 = vmov 0   ;;  %vm100_vm1 = vcmask 7168   ;;  %s249_s0 = smov [#allocation2]  }
   0x5   :  { %208 = vmatpush3.bf16.msra.mxu0 %v205_v3  ;;  %215 = vset.pattern.permute.xlu0 %v248_v8  ;;  %s178_s1 = sshll.u32 %s249_s0, 4  ;;  %vm167_vm2 = vcmask 1041409   ;;  %vm170_vm3 = vcmask 254976   ;;  %s179_s1 = int_to_ptr.vmem [resolvable:$true] %s178_s1 }
   0x6   :  { %210 = vmatprep.subr.bf16.mxu0 %v209_v6  ;;  %s224_s21 = scalar_lea.vmem %s179_s1, 32  ;;  %p229_p1 = scmp.lt.s32.totalorder %s179_s1, %s179_s1 }
   0x7   :  { %p225_p0 = scmp.ne.s32.totalorder %s179_s1, %s224_s21  ;;  %p230_p2 = scmp.lt.s32.totalorder %s224_s21, %s224_s21 }
   0x9   :  { %212 = vmatpush3.bf16.msra.mxu0 %v209_v6  ;;  %p231_p3 = por %p230_p2, %p229_p1 }
   0xb   :  { %p232_p4 = pnand %p231_p3, %p225_p0 }
   0xc   :  { %203 = vmatmul.mubr.msk.f32.vlgmr.msra.gmra.mrb[0].mxu0 %vm18_vm0, %v13_v7 }
  0xdf   :  { %v204_v9 = vpop.f32.mrb[0].mxu0 }
  0xe0   :  { %v108_v10 = vsel %vm100_vm1, %v204_v9, -inf  ;;  %v91_v11 = vpop.f32.mrb[1].mxu0 }
  0xe1   :  { %v109_v12 = vrot.slane %v108_v10, 4  ;;  %v101_v13 = vsel %vm100_vm1, %v91_v11, -inf }
  0xe2   :  { %v102_v14 = vrot.slane %v101_v13, 4 }
  0xe3   :  { %v110_v15 = vmax.f32 %v108_v10, %v109_v12 }
  0xe4   :  { %v103_v16 = vmax.f32 %v101_v13, %v102_v14 }
  0xe5   :  { %v111_v17 = vrot.slane %v110_v15, 2 }
  0xe6   :  { %v104_v18 = vrot.slane %v103_v16, 2 }
  0xe7   :  { %v112_v19 = vmax.f32 %v110_v15, %v111_v17 }
  0xe8   :  { %v105_v20 = vmax.f32 %v103_v16, %v104_v18 }
  0xe9   :  { %v113_v21 = vrot.slane %v112_v19, 1 }
  0xea   :  { %v106_v22 = vrot.slane %v105_v20, 1 }
  0xeb   :  { %v114_v23 = vmax.f32 %v112_v19, %v113_v21 }
  0xec   :  { %v107_v24 = vmax.f32 %v105_v20, %v106_v22 }
  0xed   :  { %v116_v25 = vsub.f32 %v204_v9, %v114_v23 }
  0xee   :  { %v115_v26 = vsub.f32 %v91_v11, %v107_v24 }
  0xef   :  { %v119_v27 = vmul.f32 1.442695, %v116_v25 }
  0xf0   :  { %v117_v28 = vmul.f32 1.442695, %v115_v26 }
  0xf1   :  { %216 = vpow2.f32 %v119_v27 }
  0xf2   :  { %218 = vpow2.f32 %v117_v28 }
  0xfb   :  { %v217_v29 = vpop.eup %216 }
  0xfc   :  { %v219_v30 = vpop.eup %218  ;;  %v128_v31 = vsel %vm100_vm1, %v217_v29, 0.0 }
  0xfd   :  { %v129_v32 = vrot.slane %v128_v31, 4  ;;  %v121_v33 = vsel %vm100_vm1, %v219_v30, 0.0 }
  0xfe   :  { %v122_v34 = vrot.slane %v121_v33, 4 }
  0xff   :  { %v130_v35 = vadd.f32 %v129_v32, %v128_v31 }
 0x100   :  { %v123_v36 = vadd.f32 %v122_v34, %v121_v33 }
 0x101   :  { %v131_v37 = vrot.slane %v130_v35, 2 }
 0x102   :  { %v124_v38 = vrot.slane %v123_v36, 2 }
 0x103   :  { %v132_v39 = vadd.f32 %v131_v37, %v130_v35 }
 0x104   :  { %v125_v40 = vadd.f32 %v124_v38, %v123_v36 }
 0x105   :  { %v133_v41 = vrot.slane %v132_v39, 1 }
 0x106   :  { %v126_v42 = vrot.slane %v125_v40, 1 }
 0x107   :  { %v134_v43 = vadd.f32 %v133_v41, %v132_v39 }
 0x108   :  { %v127_v44 = vadd.f32 %v126_v42, %v125_v40 }
 0x10a   :  { %220 = vrcp.f32 %v127_v44 }
 0x10b   :  { %222 = vrcp.f32 %v134_v43 }
 0x114   :  { %v221_v45 = vpop.eup %220 }
 0x115   :  { %v136_v46 = vmul.f32 %v221_v45, %v219_v30  ;;  %v223_v47 = vpop.eup %222 }
 0x116   :  { %v138_v48 = vmul.f32 %v223_v47, %v217_v29 }
 0x117   :  { %141 = vperm.xlu0 %215, %v136_v46  }
 0x11b   :  { %146 = vperm.xlu0 %215, %v138_v48  }
 0x196   :  { %v142_v49 = vpop.permute.xlu0 %141 }
 0x197   :  { %v149_v50 = vmul.f32 %v142_v49, %v12_v5 }
 0x199   :  { %v151_v51 = vsel %vm18_vm0, %v149_v50, 0.0 }
 0x19a   :  { %v152_v52 = vrot.slane %v151_v51, 4  ;;  %v147_v53 = vpop.permute.xlu0 %146 }
 0x19b   :  { %v150_v54 = vmul.f32 %v147_v53, %v13_v7 }
 0x19c   :  { %v153_v55 = vadd.f32 %v152_v52, %v151_v51 }
 0x19d   :  { %v158_v56 = vsel %vm18_vm0, %v150_v54, 0.0 }
 0x19e   :  { %v154_v57 = vrot.slane %v153_v55, 2  ;;  %v159_v58 = vrot.slane %v158_v56, 4 }
 0x1a0   :  { %v155_v59 = vadd.f32 %v154_v57, %v153_v55  ;;  %v160_v60 = vadd.f32 %v159_v58, %v158_v56 }
 0x1a2   :  { %v161_v61 = vrot.slane %v160_v60, 2  ;;  %v156_v62 = vrot.slane %v155_v59, 1 }
 0x1a4   :  { %v162_v63 = vadd.f32 %v161_v61, %v160_v60  ;;  %v157_v1 = vadd.f32 %v156_v62, %v155_v59 }
 0x1a6   :  { %v163_v0 = vrot.slane %v162_v63, 1 }
 0x1a8   :  { %v164_v2 = vadd.f32 %v163_v0, %v162_v63 }
 0x1aa   :  { %v168_v3 = vsel %vm167_vm2, %v164_v2, %v157_v1 }
 0x1ab   :  { %171 = vst.msk [vmem:[#allocation2] sm:$0x3] %vm170_vm3, %v168_v3 }
 0x1ac   :  { %235 = shalt.err (!%p232_p4)
}
 0x1ad   :  { %s236_s24 = scalar_lea.hbm %s305_s2, 32 }
 0x1ae   :  { %p237_p5 = scmp.ne.s32.totalorder %s305_s2, %s236_s24  ;;  %p240_p6 = scmp.lt.u32.totalorder %s236_s24, %s305_s2 }
 0x1b0   :  { %p242_p7 = pnand %p240_p6, %p237_p5 }
 0x1b2   :  { %245 = shalt.err (!%p242_p7)
}
 0x1b3   :  { %181 = dma.vmem_to_hbm [thread:$0]  %s179_s1, 32, %s305_s2, [#allocation3]  }
 0x1b4   :  { %246 = dma.done.wait [#allocation3], 32  }
 0x1b5   :  { %247 = vsyncadd [#allocation3], 4294967264 }
 0x1b6   :  { %185 = vsyncpa [#allocation3], 1 }

</bundles_post_ra>
